<compile_context>
chip_gen: v7x
topology: tpu7x:2x2x1
jax: 0.10.0
libtpu: 0.0.40
codegen_flags: <defaults>
</compile_context>

<pallas_src>
import jax
import jax.numpy as jnp
from jax.experimental import pallas as pl
from jax.experimental.pallas import tpu as pltpu


def _round_up(n, m=128):
    return ((n + m - 1) // m) * m


def _vmem_capacity_bytes():
    """Generation-aware VMEM capacity (falls back to the v7x 64 MiB floor)."""
    try:
        cap = int(pltpu.get_tpu_info().vmem_capacity_bytes)
        if cap > 0:
            return cap
    except Exception:
        pass
    return 64 * 1024 * 1024


# --------------------------------------------------------------------------
# Kernel 1: conv3x3 (one fused K=9C matmul) + bias + ReLU + global-avg-pool.
# --------------------------------------------------------------------------
def _conv_gap_kernel(patches_ref, cw_ref, cb_ref, pool_ref, feats_ref):
    """patches_ref: (1, Bt*H*W, 9C)  im2col rows for Bt images (f32)
       cw_ref     : (9C, F_pad)      conv weight, rows ordered (ky, kx, c)
       cb_ref     : (1, F_pad)       conv bias (lane-padded)
       pool_ref   : (Bt, Bt*H*W)     block-diagonal 1/(H*W) pooling matrix
       feats_ref  : (1, Bt, F_pad)   pooled features for this batch tile
    """
    p = patches_ref[0]                                        # (Bt*HW, 9C)
    conv = jnp.dot(p, cw_ref[...], preferred_element_type=jnp.float32)
    conv = jnp.maximum(conv + cb_ref[...], 0.0)               # (Bt*HW, F_pad)
    # Global average pool on the MXU (no reshape / cross-sublane reduce).
    feats_ref[0] = jnp.dot(pool_ref[...], conv,
                           preferred_element_type=jnp.float32)  # (Bt, F_pad)


# --------------------------------------------------------------------------
# Kernel 2: emb_net (Linear -> ReLU -> Linear) + head, batched over rows.
# --------------------------------------------------------------------------
def _mlp_head_kernel(feats_ref, w1_ref, b1_ref, w2_ref, b2_ref, hw_ref, hb_ref,
                     emb_ref, logits_ref):
    f = feats_ref[...]                                        # (bm, F_pad)
    h = jnp.dot(f, w1_ref[...], preferred_element_type=jnp.float32) + b1_ref[...]
    h = jnp.maximum(h, 0.0)
    emb = jnp.dot(h, w2_ref[...], preferred_element_type=jnp.float32) + b2_ref[...]
    emb_ref[...] = emb
    logits_ref[...] = (jnp.dot(emb, hw_ref[...], preferred_element_type=jnp.float32)
                       + hb_ref[...])


# --------------------------------------------------------------------------
# Wrapper
# --------------------------------------------------------------------------
def clsnet_forward(image, params):
    """image: (B, C, H, W) float32, PyTorch NCHW convention."""
    B, C, H, W = image.shape
    F = params["conv_w"].shape[0]
    H1 = params["w1"].shape[0]
    E = params["w2"].shape[0]
    NC = params["head_w"].shape[0]
    f_pad, h1_pad, e_pad, nc_pad = (_round_up(v) for v in (F, H1, E, NC))
    HW = H * W
    KC = 9 * C

    vmem_cap = _vmem_capacity_bytes()
    tile_budget = vmem_cap // 8                  # ~8 MiB on v7x, ~16 MiB on v5e/v6e
    vmem_limit = int(min(vmem_cap // 2, 64 * 1024 * 1024))

    # Batch tile: large enough to amortize per-step overhead and fill MXU rows
    # (M = Bt*H*W), small enough that the live set (double-buffered patch block
    # + f32 conv tile) fits the generation-aware budget, and leaving >=2 grid
    # steps when B >= 2 so v7x's two TensorCores both get work.
    per_img_bytes = 2 * HW * KC * 4 + HW * f_pad * 4
    bt_cap = max(1, tile_budget // per_img_bytes)
    Bt = int(max(1, min(8, bt_cap, (B + 1) // 2)))
    n_tiles = int(pl.cdiv(B, Bt))
    B_pad = n_tiles * Bt

    # ---- glue (layout only): NCHW -> padded NHWC -> im2col rows, (ky,kx,c) ----
    x = jnp.transpose(image, (0, 2, 3, 1)).astype(jnp.float32)      # (B,H,W,C)
    xp = jnp.pad(x, ((0, 0), (1, 1), (1, 1), (0, 0)))               # (B,H+2,W+2,C)
    taps = [xp[:, dy:dy + H, dx:dx + W, :] for dy in range(3) for dx in range(3)]
    patches = jnp.stack(taps, axis=3).reshape(B, HW, KC)            # (B,HW,9C)
    patches = jnp.pad(patches, ((0, B_pad - B), (0, 0), (0, 0)))
    patches = patches.reshape(n_tiles, Bt * HW, KC)                 # fold Bt into M

    # ---- conv params -> lane-padded matmul layout (f32 end-to-end) ----
    cw = jnp.transpose(params["conv_w"], (2, 3, 1, 0)).reshape(KC, F)
    cw = jnp.pad(cw, ((0, 0), (0, f_pad - F))).astype(jnp.float32)
    cb = jnp.pad(params["conv_b"], (0, f_pad - F)).reshape(1, f_pad).astype(jnp.float32)

    # Block-diagonal mean-pool matrix: feats = pool @ relu(patches @ cw + cb).
    row = jnp.arange(Bt, dtype=jnp.int32)[:, None]
    col = jnp.arange(Bt * HW, dtype=jnp.int32)[None, :] // HW
    pool = jnp.where(row == col, 1.0 / HW, 0.0).astype(jnp.float32)  # (Bt, Bt*HW)

    conv_flops = 2 * B_pad * HW * KC * f_pad + 2 * n_tiles * Bt * Bt * HW * f_pad
    conv_bytes = (patches.size + cw.size + cb.size + pool.size
                  + n_tiles * Bt * f_pad) * 4

    feats_t = pl.pallas_call(
        _conv_gap_kernel,
        out_shape=jax.ShapeDtypeStruct((n_tiles, Bt, f_pad), jnp.float32),
        grid=(n_tiles,),
        in_specs=[
            pl.BlockSpec((1, Bt * HW, KC), lambda b: (b, 0, 0)),     # patch rows
            pl.BlockSpec((KC, f_pad), lambda b: (0, 0)),             # conv weight
            pl.BlockSpec((1, f_pad), lambda b: (0, 0)),              # conv bias
            pl.BlockSpec((Bt, Bt * HW), lambda b: (0, 0)),           # pool matrix
        ],
        out_specs=pl.BlockSpec((1, Bt, f_pad), lambda b: (b, 0, 0)),
        compiler_params=pltpu.CompilerParams(
            dimension_semantics=("parallel",),
            vmem_limit_bytes=vmem_limit),
        cost_estimate=pl.CostEstimate(flops=int(conv_flops), transcendentals=0,
                                      bytes_accessed=int(conv_bytes)),
    )(patches, cw, cb, pool)

    # ---- emb_net + head, hoisted out of the per-image grid (batched M=B) ----
    feats = feats_t.reshape(B_pad, f_pad)
    rows = B_pad
    if rows <= 256:
        bm, rows_pad = rows, rows
    else:
        bm = 256
        rows_pad = _round_up(rows, 256)
        feats = jnp.pad(feats, ((0, rows_pad - rows), (0, 0)))
    nb = rows_pad // bm

    w1 = jnp.pad(params["w1"].T, ((0, f_pad - F), (0, h1_pad - H1))).astype(jnp.float32)
    b1 = jnp.pad(params["b1"], (0, h1_pad - H1)).reshape(1, h1_pad).astype(jnp.float32)
    w2 = jnp.pad(params["w2"].T, ((0, h1_pad - H1), (0, e_pad - E))).astype(jnp.float32)
    b2 = jnp.pad(params["b2"], (0, e_pad - E)).reshape(1, e_pad).astype(jnp.float32)
    hw = jnp.pad(params["head_w"].T, ((0, e_pad - E), (0, nc_pad - NC))).astype(jnp.float32)
    hb = jnp.pad(params["head_b"], (0, nc_pad - NC)).reshape(1, nc_pad).astype(jnp.float32)

    mlp_flops = 2 * rows_pad * (f_pad * h1_pad + h1_pad * e_pad + e_pad * nc_pad)
    mlp_bytes = (feats.size + w1.size + b1.size + w2.size + b2.size + hw.size
                 + hb.size + rows_pad * (e_pad + nc_pad)) * 4

    emb_full, logits_full = pl.pallas_call(
        _mlp_head_kernel,
        out_shape=(jax.ShapeDtypeStruct((rows_pad, e_pad), jnp.float32),
                   jax.ShapeDtypeStruct((rows_pad, nc_pad), jnp.float32)),
        grid=(nb,),
        in_specs=[
            pl.BlockSpec((bm, f_pad), lambda i: (i, 0)),
            pl.BlockSpec((f_pad, h1_pad), lambda i: (0, 0)),
            pl.BlockSpec((1, h1_pad), lambda i: (0, 0)),
            pl.BlockSpec((h1_pad, e_pad), lambda i: (0, 0)),
            pl.BlockSpec((1, e_pad), lambda i: (0, 0)),
            pl.BlockSpec((e_pad, nc_pad), lambda i: (0, 0)),
            pl.BlockSpec((1, nc_pad), lambda i: (0, 0)),
        ],
        out_specs=(pl.BlockSpec((bm, e_pad), lambda i: (i, 0)),
                   pl.BlockSpec((bm, nc_pad), lambda i: (i, 0))),
        compiler_params=pltpu.CompilerParams(
            dimension_semantics=("parallel",),
            vmem_limit_bytes=vmem_limit),
        cost_estimate=pl.CostEstimate(flops=int(mlp_flops), transcendentals=0,
                                      bytes_accessed=int(mlp_bytes)),
    )(feats, w1, b1, w2, b2, hw, hb)

    return emb_full[:B, :E], logits_full[:B, :NC]


# --------------------------------------------------------------------------
# Pure-JAX reference (matches the PyTorch semantics) and synthetic params.
# --------------------------------------------------------------------------
def clsnet_reference(image, params):
    B, C, H, W = image.shape
    x = jnp.transpose(image, (0, 2, 3, 1))
    xp = jnp.pad(x, ((0, 0), (1, 1), (1, 1), (0, 0)))
    taps = [xp[:, dy:dy + H, dx:dx + W, :] for dy in range(3) for dx in range(3)]
    patches = jnp.stack(taps, axis=3).reshape(B * H * W, 9 * C)
    conv_w = jnp.transpose(params["conv_w"], (2, 3, 1, 0)).reshape(9 * C, -1)
    conv = jnp.maximum(patches @ conv_w + params["conv_b"][None, :], 0.0)
    feats = jnp.mean(conv.reshape(B, H * W, -1), axis=1)
    h = jnp.maximum(feats @ params["w1"].T + params["b1"][None, :], 0.0)
    emb = h @ params["w2"].T + params["b2"][None, :]
    logits = emb @ params["head_w"].T + params["head_b"][None, :]
    return emb, logits


def init_params(key, in_ch, hiddens, emb_size, n_cls):
    """Deterministic synthetic params in PyTorch layouts."""
    ks = jax.random.split(key, 8)
    feat = hiddens[0]          # encoder output dim == emb_net input dim
    h1 = hiddens[1]
    return {
        "conv_w": 0.1 * jax.random.normal(ks[0], (feat, in_ch, 3, 3), jnp.float32),
        "conv_b": 0.1 * jax.random.normal(ks[1], (feat,), jnp.float32),
        "w1": 0.1 * jax.random.normal(ks[2], (h1, feat), jnp.float32),
        "b1": 0.1 * jax.random.normal(ks[3], (h1,), jnp.float32),
        "w2": 0.1 * jax.random.normal(ks[4], (emb_size, h1), jnp.float32),
        "b2": 0.1 * jax.random.normal(ks[5], (emb_size,), jnp.float32),
        "head_w": 0.1 * jax.random.normal(ks[6], (n_cls, emb_size), jnp.float32),
        "head_b": 0.1 * jax.random.normal(ks[7], (n_cls,), jnp.float32),
    }


if __name__ == "__main__":
    # Small shapes consistent with the module:
    #   image (B=2, C=4, H=16, W=16), hiddens=[32, 16], emb_size=8, n_cls=5
    B, C, H, W = 2, 4, 16, 16
    hiddens, emb_size, n_cls = [32, 16], 8, 5

    key = jax.random.PRNGKey(0)
    k_img, k_par = jax.random.split(key)
    image = jax.random.normal(k_img, (B, C, H, W), jnp.float32)
    params = init_params(k_par, C, hiddens, emb_size, n_cls)

    emb, logits = jax.jit(clsnet_forward)(image, params)
    jax.block_until_ready((emb, logits))

    emb_ref, logits_ref = clsnet_reference(image, params)
    assert emb.shape == (B, emb_size) and logits.shape == (B, n_cls)
    assert jnp.allclose(emb, emb_ref, rtol=2e-2, atol=2e-2)
    assert jnp.allclose(logits, logits_ref, rtol=2e-2, atol=2e-2)

    print("KERNEL_OK")
</pallas_src>

<mosaic_0001>
module attributes {stable_mosaic.version = 11 : i64} {
  func.func @_conv_gap_kernel(%arg0: i32, %arg1: memref<1x256x36xf32, #tpu.memory_space<vmem>>, %arg2: memref<36x128xf32, #tpu.memory_space<vmem>>, %arg3: memref<1x128xf32, #tpu.memory_space<vmem>>, %arg4: memref<1x256xf32, #tpu.memory_space<vmem>>, %arg5: memref<1x1x128xf32, #tpu.memory_space<vmem>>) attributes {dimension_semantics = [#tpu.dimension_semantics<parallel>], iteration_bounds = array<i64: 2>, scalar_prefetch = 0 : i64, scratch_operands = 0 : i64, tpu.core_type = #tpu.core_type<tc>, window_params = [{transform_indices = @transform_0, window_bounds = array<i64: 1, 256, 36>}, {pipeline_mode = #tpu.pipeline_mode<synchronous>, transform_indices = @transform_1, window_bounds = array<i64: 36, 128>}, {pipeline_mode = #tpu.pipeline_mode<synchronous>, transform_indices = @transform_2, window_bounds = array<i64: 1, 128>}, {pipeline_mode = #tpu.pipeline_mode<synchronous>, transform_indices = @transform_3, window_bounds = array<i64: 1, 256>}, {transform_indices = @transform_4, window_bounds = array<i64: 1, 1, 128>}]} {
    %c0 = arith.constant 0 : index
    %c0_0 = arith.constant 0 : index
    %c0_1 = arith.constant 0 : index
    %0 = vector.load %arg1[%c0, %c0_0, %c0_1] : memref<1x256x36xf32, #tpu.memory_space<vmem>>, vector<1x256x36xf32>
    %1 = vector.shape_cast %0 : vector<1x256x36xf32> to vector<256x36xf32>
    %c0_2 = arith.constant 0 : index
    %c0_3 = arith.constant 0 : index
    %2 = vector.load %arg2[%c0_2, %c0_3] : memref<36x128xf32, #tpu.memory_space<vmem>>, vector<36x128xf32>
    %cst = arith.constant dense<0.000000e+00> : vector<256x128xf32>
    %3 = tpu.matmul %1, %2, %cst {dimension_numbers = #tpu.dot_dimension_numbers<[1], [0], [0], [1], [0, 0, 1, 1], [], []>} : vector<256x36xf32>, vector<36x128xf32>, vector<256x128xf32> -> vector<256x128xf32>
    %c0_4 = arith.constant 0 : index
    %c0_5 = arith.constant 0 : index
    %4 = vector.load %arg3[%c0_4, %c0_5] : memref<1x128xf32, #tpu.memory_space<vmem>>, vector<1x128xf32>
    %5 = vector.broadcast %4 : vector<1x128xf32> to vector<256x128xf32>
    %6 = arith.addf %3, %5 : vector<256x128xf32>
    %cst_6 = arith.constant 0.000000e+00 : f32
    %7 = vector.broadcast %cst_6 : f32 to vector<256x128xf32>
    %8 = arith.maximumf %6, %7 : vector<256x128xf32>
    %c0_7 = arith.constant 0 : index
    %c0_8 = arith.constant 0 : index
    %9 = vector.load %arg4[%c0_7, %c0_8] : memref<1x256xf32, #tpu.memory_space<vmem>>, vector<1x256xf32>
    %cst_9 = arith.constant dense<0.000000e+00> : vector<1x128xf32>
    %10 = tpu.matmul %9, %8, %cst_9 {dimension_numbers = #tpu.dot_dimension_numbers<[1], [0], [0], [1], [0, 0, 1, 1], [], []>} : vector<1x256xf32>, vector<256x128xf32>, vector<1x128xf32> -> vector<1x128xf32>
    %c0_10 = arith.constant 0 : index
    %c0_11 = arith.constant 0 : index
    %c0_12 = arith.constant 0 : index
    %11 = vector.load %arg5[%c0_10, %c0_11, %c0_12] : memref<1x1x128xf32, #tpu.memory_space<vmem>>, vector<1x1x128xf32>
    %12 = vector.shape_cast %11 : vector<1x1x128xf32> to vector<1x128xf32>
    %13 = vector.shape_cast %10 : vector<1x128xf32> to vector<1x1x128xf32>
    tpu.vector_store %arg5[%c0_10, %c0_11, %c0_12], %13 {strides = array<i32>} : memref<1x1x128xf32, #tpu.memory_space<vmem>>, vector<1x1x128xf32>,
    return
  }
  func.func @transform_0(%arg0: i32) -> (i32, i32, i32) {
    %c0_i32 = arith.constant 0 : i32
    %c0_i32_0 = arith.constant 0 : i32
    %c0_i32_1 = arith.constant 0 : i32
    return %arg0, %c0_i32, %c0_i32_0 : i32, i32, i32
  }
  func.func @transform_1(%arg0: i32) -> (i32, i32) {
    %c0_i32 = arith.constant 0 : i32
    %c0_i32_0 = arith.constant 0 : i32
    %c0_i32_1 = arith.constant 0 : i32
    return %c0_i32, %c0_i32_0 : i32, i32
  }
  func.func @transform_2(%arg0: i32) -> (i32, i32) {
    %c0_i32 = arith.constant 0 : i32
    %c0_i32_0 = arith.constant 0 : i32
    %c0_i32_1 = arith.constant 0 : i32
    return %c0_i32, %c0_i32_0 : i32, i32
  }
  func.func @transform_3(%arg0: i32) -> (i32, i32) {
    %c0_i32 = arith.constant 0 : i32
    %c0_i32_0 = arith.constant 0 : i32
    %c0_i32_1 = arith.constant 0 : i32
    return %c0_i32, %c0_i32_0 : i32, i32
  }
  func.func @transform_4(%arg0: i32) -> (i32, i32, i32) {
    %c0_i32 = arith.constant 0 : i32
    %c0_i32_0 = arith.constant 0 : i32
    %c0_i32_1 = arith.constant 0 : i32
    return %arg0, %c0_i32, %c0_i32_0 : i32, i32, i32
  }
}

module attributes {stable_mosaic.version = 11 : i64} {
  func.func @_mlp_head_kernel(%arg0: i32, %arg1: memref<2x128xf32, #tpu.memory_space<vmem>>, %arg2: memref<128x128xf32, #tpu.memory_space<vmem>>, %arg3: memref<1x128xf32, #tpu.memory_space<vmem>>, %arg4: memref<128x128xf32, #tpu.memory_space<vmem>>, %arg5: memref<1x128xf32, #tpu.memory_space<vmem>>, %arg6: memref<128x128xf32, #tpu.memory_space<vmem>>, %arg7: memref<1x128xf32, #tpu.memory_space<vmem>>, %arg8: memref<2x128xf32, #tpu.memory_space<vmem>>, %arg9: memref<2x128xf32, #tpu.memory_space<vmem>>) attributes {dimension_semantics = [#tpu.dimension_semantics<parallel>], iteration_bounds = array<i64: 1>, scalar_prefetch = 0 : i64, scratch_operands = 0 : i64, tpu.core_type = #tpu.core_type<tc>, window_params = [{transform_indices = @transform_0, window_bounds = array<i64: 2, 128>}, {pipeline_mode = #tpu.pipeline_mode<synchronous>, transform_indices = @transform_1, window_bounds = array<i64: 128, 128>}, {pipeline_mode = #tpu.pipeline_mode<synchronous>, transform_indices = @transform_2, window_bounds = array<i64: 1, 128>}, {pipeline_mode = #tpu.pipeline_mode<synchronous>, transform_indices = @transform_3, window_bounds = array<i64: 128, 128>}, {pipeline_mode = #tpu.pipeline_mode<synchronous>, transform_indices = @transform_4, window_bounds = array<i64: 1, 128>}, {pipeline_mode = #tpu.pipeline_mode<synchronous>, transform_indices = @transform_5, window_bounds = array<i64: 128, 128>}, {pipeline_mode = #tpu.pipeline_mode<synchronous>, transform_indices = @transform_6, window_bounds = array<i64: 1, 128>}, {transform_indices = @transform_7, window_bounds = array<i64: 2, 128>}, {transform_indices = @transform_8, window_bounds = array<i64: 2, 128>}]} {
    %c0 = arith.constant 0 : index
    %c0_0 = arith.constant 0 : index
    %0 = vector.load %arg1[%c0, %c0_0] : memref<2x128xf32, #tpu.memory_space<vmem>>, vector<2x128xf32>
    %c0_1 = arith.constant 0 : index
    %c0_2 = arith.constant 0 : index
    %1 = vector.load %arg2[%c0_1, %c0_2] : memref<128x128xf32, #tpu.memory_space<vmem>>, vector<128x128xf32>
    %cst = arith.constant dense<0.000000e+00> : vector<2x128xf32>
    %2 = tpu.matmul %0, %1, %cst {dimension_numbers = #tpu.dot_dimension_numbers<[1], [0], [0], [1], [0, 0, 1, 1], [], []>} : vector<2x128xf32>, vector<128x128xf32>, vector<2x128xf32> -> vector<2x128xf32>
    %c0_3 = arith.constant 0 : index
    %c0_4 = arith.constant 0 : index
    %3 = vector.load %arg3[%c0_3, %c0_4] : memref<1x128xf32, #tpu.memory_space<vmem>>, vector<1x128xf32>
    %4 = vector.broadcast %3 : vector<1x128xf32> to vector<2x128xf32>
    %5 = arith.addf %2, %4 : vector<2x128xf32>
    %cst_5 = arith.constant 0.000000e+00 : f32
    %6 = vector.broadcast %cst_5 : f32 to vector<2x128xf32>
    %7 = arith.maximumf %5, %6 : vector<2x128xf32>
    %c0_6 = arith.constant 0 : index
    %c0_7 = arith.constant 0 : index
    %8 = vector.load %arg4[%c0_6, %c0_7] : memref<128x128xf32, #tpu.memory_space<vmem>>, vector<128x128xf32>
    %cst_8 = arith.constant dense<0.000000e+00> : vector<2x128xf32>
    %9 = tpu.matmul %7, %8, %cst_8 {dimension_numbers = #tpu.dot_dimension_numbers<[1], [0], [0], [1], [0, 0, 1, 1], [], []>} : vector<2x128xf32>, vector<128x128xf32>, vector<2x128xf32> -> vector<2x128xf32>
    %c0_9 = arith.constant 0 : index
    %c0_10 = arith.constant 0 : index
    %10 = vector.load %arg5[%c0_9, %c0_10] : memref<1x128xf32, #tpu.memory_space<vmem>>, vector<1x128xf32>
    %11 = vector.broadcast %10 : vector<1x128xf32> to vector<2x128xf32>
    %12 = arith.addf %9, %11 : vector<2x128xf32>
    %c0_11 = arith.constant 0 : index
    %c0_12 = arith.constant 0 : index
    %13 = vector.load %arg8[%c0_11, %c0_12] : memref<2x128xf32, #tpu.memory_space<vmem>>, vector<2x128xf32>
    tpu.vector_store %arg8[%c0_11, %c0_12], %12 {strides = array<i32>} : memref<2x128xf32, #tpu.memory_space<vmem>>, vector<2x128xf32>,
    %c0_13 = arith.constant 0 : index
    %c0_14 = arith.constant 0 : index
    %14 = vector.load %arg6[%c0_13, %c0_14] : memref<128x128xf32, #tpu.memory_space<vmem>>, vector<128x128xf32>
    %cst_15 = arith.constant dense<0.000000e+00> : vector<2x128xf32>
    %15 = tpu.matmul %12, %14, %cst_15 {dimension_numbers = #tpu.dot_dimension_numbers<[1], [0], [0], [1], [0, 0, 1, 1], [], []>} : vector<2x128xf32>, vector<128x128xf32>, vector<2x128xf32> -> vector<2x128xf32>
    %c0_16 = arith.constant 0 : index
    %c0_17 = arith.constant 0 : index
    %16 = vector.load %arg7[%c0_16, %c0_17] : memref<1x128xf32, #tpu.memory_space<vmem>>, vector<1x128xf32>
    %17 = vector.broadcast %16 : vector<1x128xf32> to vector<2x128xf32>
    %18 = arith.addf %15, %17 : vector<2x128xf32>
    %c0_18 = arith.constant 0 : index
    %c0_19 = arith.constant 0 : index
    %19 = vector.load %arg9[%c0_18, %c0_19] : memref<2x128xf32, #tpu.memory_space<vmem>>, vector<2x128xf32>
    tpu.vector_store %arg9[%c0_18, %c0_19], %18 {strides = array<i32>} : memref<2x128xf32, #tpu.memory_space<vmem>>, vector<2x128xf32>,
    return
  }
  func.func @transform_0(%arg0: i32) -> (i32, i32) {
    %c0_i32 = arith.constant 0 : i32
    %c0_i32_0 = arith.constant 0 : i32
    return %arg0, %c0_i32 : i32, i32
  }
  func.func @transform_1(%arg0: i32) -> (i32, i32) {
    %c0_i32 = arith.constant 0 : i32
    %c0_i32_0 = arith.constant 0 : i32
    %c0_i32_1 = arith.constant 0 : i32
    return %c0_i32, %c0_i32_0 : i32, i32
  }
  func.func @transform_2(%arg0: i32) -> (i32, i32) {
    %c0_i32 = arith.constant 0 : i32
    %c0_i32_0 = arith.constant 0 : i32
    %c0_i32_1 = arith.constant 0 : i32
    return %c0_i32, %c0_i32_0 : i32, i32
  }
  func.func @transform_3(%arg0: i32) -> (i32, i32) {
    %c0_i32 = arith.constant 0 : i32
    %c0_i32_0 = arith.constant 0 : i32
    %c0_i32_1 = arith.constant 0 : i32
    return %c0_i32, %c0_i32_0 : i32, i32
  }
  func.func @transform_4(%arg0: i32) -> (i32, i32) {
    %c0_i32 = arith.constant 0 : i32
    %c0_i32_0 = arith.constant 0 : i32
    %c0_i32_1 = arith.constant 0 : i32
    return %c0_i32, %c0_i32_0 : i32, i32
  }
  func.func @transform_5(%arg0: i32) -> (i32, i32) {
    %c0_i32 = arith.constant 0 : i32
    %c0_i32_0 = arith.constant 0 : i32
    %c0_i32_1 = arith.constant 0 : i32
    return %c0_i32, %c0_i32_0 : i32, i32
  }
  func.func @transform_6(%arg0: i32) -> (i32, i32) {
    %c0_i32 = arith.constant 0 : i32
    %c0_i32_0 = arith.constant 0 : i32
    %c0_i32_1 = arith.constant 0 : i32
    return %c0_i32, %c0_i32_0 : i32, i32
  }
  func.func @transform_7(%arg0: i32) -> (i32, i32) {
    %c0_i32 = arith.constant 0 : i32
    %c0_i32_0 = arith.constant 0 : i32
    return %arg0, %c0_i32 : i32, i32
  }
  func.func @transform_8(%arg0: i32) -> (i32, i32) {
    %c0_i32 = arith.constant 0 : i32
    %c0_i32_0 = arith.constant 0 : i32
    return %arg0, %c0_i32 : i32, i32
  }
}

</mosaic_0001>

<bundles_post_ra>
// kernel: clsnet_forward.3
= control target key start
LH: loop header
LB: loop body
LE: loop exit
PB: predicated region body
PF: predicated region fallthrough
CT: control target
= control target key end

     0   :  { %14 = vsyncpa [#allocation3], 0  ;;  %v625_v3 = vmov 0.0|0.0   ;;  %vm626_vm0 = vmmov 0   ;;  %v627_v6 = vmov 0.0   ;;  %s885_s0 = inlined_call_operand.vmem [shape: f32[2,128], index: 0, kind: input, shape index: {}]   ;;  %s886_s1 = inlined_call_operand.vmem [shape: f32[128,128], index: 1, kind: input, shape index: {}]   ;;  %s887_s2 = inlined_call_operand.vmem [shape: f32[1,128], index: 2, kind: input, shape index: {}]   ;;  %s888_s3 = inlined_call_operand.vmem [shape: f32[128,128], index: 3, kind: input, shape index: {}]   ;;  %s889_s4 = inlined_call_operand.vmem [shape: f32[1,128], index: 4, kind: input, shape index: {}]   ;;  %s890_s5 = inlined_call_operand.vmem [shape: f32[128,128], index: 5, kind: input, shape index: {}]   ;;  %s891_s6 = inlined_call_operand.vmem [shape: f32[1,128], index: 6, kind: input, shape index: {}]   ;;  %s892_s7 = inlined_call_operand.hbm [shape: f32[2,128], index: 7, kind: output, shape index: {0}]   ;;  %s893_s8 = inlined_call_operand.hbm [shape: f32[2,128], index: 8, kind: output, shape index: {1}]  }
   0x1   :  { %v31_v0 = vld [vmem:[%s886_s1] sm:$0xff]  ;;  %v32_v1 = vld [vmem:[%s886_s1 + $0x8] sm:$0xff]  ;;  %v33_v2 = vld [vmem:[%s886_s1 + $0x10] sm:$0xff]  ;;  %500 = vmatprep.subr.bf16.mxu0 %v625_v3  ;;  %427 = vmatprep.mubr.msk.f32.mxu0 %vm626_vm0, %v627_v6 }
   0x2   :  { %v501_v4 = vpack.c.bf16 %v32_v1, %v31_v0  ;;  %v34_v5 = vld [vmem:[%s886_s1 + $0x18] sm:$0xff]  ;;  %524 = vmatprep.subr.bf16.mxu1 %v625_v3  ;;  %462 = vmatprep.mubr.msk.f32.mxu1 %vm626_vm0, %v627_v6  ;;  %v35_v8 = vld [vmem:[%s886_s1 + $0x20] sm:$0xff]  ;;  %v36_v9 = vld [vmem:[%s886_s1 + $0x28] sm:$0xff] }
   0x3   :  { %v504_v7 = vpack.c.bf16 %v34_v5, %v33_v2  ;;  %v125_v10 = vld [vmem:[%s888_s3] sm:$0xff]  ;;  %v126_v11 = vld [vmem:[%s888_s3 + $0x8] sm:$0xff]  ;;  %v127_v12 = vld [vmem:[%s888_s3 + $0x10] sm:$0xff]  ;;  %v507_v14 = vpack.c.bf16 %v36_v9, %v35_v8 }
   0x4   :  { %502 = vmatpush3.bf16.msra.mxu0 %v501_v4  ;;  %v128_v13 = vld [vmem:[%s888_s3 + $0x18] sm:$0xff]  ;;  %v525_v15 = vpack.c.bf16 %v126_v11, %v125_v10  ;;  %v37_v16 = vld [vmem:[%s886_s1 + $0x30] sm:$0xff]  ;;  %v129_v19 = vld [vmem:[%s888_s3 + $0x20] sm:$0xff] }
   0x5   :  { %503 = vmatprep.subr.bf16.mxu0 %v625_v3  ;;  %v38_v17 = vld [vmem:[%s886_s1 + $0x38] sm:$0xff]  ;;  %v528_v18 = vpack.c.bf16 %v128_v13, %v127_v12  ;;  %v130_v20 = vld [vmem:[%s888_s3 + $0x28] sm:$0xff] }
   0x6   :  { %526 = vmatpush3.bf16.msra.mxu1 %v525_v15 }
   0x7   :  { %527 = vmatprep.subr.bf16.mxu1 %v625_v3 }
   0x8   :  { %505 = vmatpush3.bf16.msra.mxu0 %v504_v7 }
   0x9   :  { %506 = vmatprep.subr.bf16.mxu0 %v625_v3 }
   0xa   :  { %15 = vsyncpa [#allocation5], 0  ;;  %v510_v21 = vpack.c.bf16 %v38_v17, %v37_v16  ;;  %v39_v22 = vld [vmem:[%s886_s1 + $0x40] sm:$0xff]  ;;  %v40_v23 = vld [vmem:[%s886_s1 + $0x48] sm:$0xff]  ;;  %529 = vmatpush3.bf16.msra.mxu1 %v528_v18  ;;  %v531_v24 = vpack.c.bf16 %v130_v20, %v129_v19 }
   0xb   :  { %530 = vmatprep.subr.bf16.mxu1 %v625_v3  ;;  %v131_v25 = vld [vmem:[%s888_s3 + $0x30] sm:$0xff]  ;;  %v132_v26 = vld [vmem:[%s888_s3 + $0x38] sm:$0xff]  ;;  %v513_v27 = vpack.c.bf16 %v40_v23, %v39_v22  ;;  %v133_v31 = vld [vmem:[%s888_s3 + $0x40] sm:$0xff] }
   0xc   :  { %508 = vmatpush3.bf16.msra.mxu0 %v507_v14  ;;  %v41_v28 = vld [vmem:[%s886_s1 + $0x50] sm:$0xff]  ;;  %v42_v29 = vld [vmem:[%s886_s1 + $0x58] sm:$0xff]  ;;  %v534_v30 = vpack.c.bf16 %v132_v26, %v131_v25  ;;  %v134_v32 = vld [vmem:[%s888_s3 + $0x48] sm:$0xff] }
   0xd   :  { %509 = vmatprep.subr.bf16.mxu0 %v625_v3  ;;  %v516_v33 = vpack.c.bf16 %v42_v29, %v41_v28  ;;  %v43_v34 = vld [vmem:[%s886_s1 + $0x60] sm:$0xff]  ;;  %v44_v35 = vld [vmem:[%s886_s1 + $0x68] sm:$0xff]  ;;  %v537_v36 = vpack.c.bf16 %v134_v32, %v133_v31  ;;  %v135_v37 = vld [vmem:[%s888_s3 + $0x50] sm:$0xff] }
   0xe   :  { %532 = vmatpush3.bf16.msra.mxu1 %v531_v24  ;;  %v136_v38 = vld [vmem:[%s888_s3 + $0x58] sm:$0xff]  ;;  %v519_v39 = vpack.c.bf16 %v44_v35, %v43_v34  ;;  %v45_v40 = vld [vmem:[%s886_s1 + $0x70] sm:$0xff]  ;;  %v137_v43 = vld [vmem:[%s888_s3 + $0x60] sm:$0xff] }
   0xf   :  { %533 = vmatprep.subr.bf16.mxu1 %v625_v3  ;;  %v46_v41 = vld [vmem:[%s886_s1 + $0x78] sm:$0xff]  ;;  %v540_v42 = vpack.c.bf16 %v136_v38, %v135_v37  ;;  %v138_v44 = vld [vmem:[%s888_s3 + $0x68] sm:$0xff]  ;;  %v30_v47 = vld [vmem:[%s885_s0] sm:$0x3] }
  0x10   :  { %511 = vmatpush3.bf16.msra.mxu0 %v510_v21  ;;  %v522_v45 = vpack.c.bf16 %v46_v41, %v45_v40  ;;  %v543_v46 = vpack.c.bf16 %v138_v44, %v137_v43  ;;  %v139_v48 = vld [vmem:[%s888_s3 + $0x70] sm:$0xff]  ;;  %v140_v49 = vld [vmem:[%s888_s3 + $0x78] sm:$0xff]  ;;  %v219_v51 = vld [vmem:[%s890_s5] sm:$0xff] }
  0x11   :  { %512 = vmatprep.subr.bf16.mxu0 %v625_v3  ;;  %v546_v50 = vpack.c.bf16 %v140_v49, %v139_v48  ;;  %v220_v52 = vld [vmem:[%s890_s5 + $0x8] sm:$0xff]  ;;  %v221_v53 = vld [vmem:[%s890_s5 + $0x10] sm:$0xff]  ;;  %v222_v55 = vld [vmem:[%s890_s5 + $0x18] sm:$0xff] }
  0x12   :  { %535 = vmatpush3.bf16.msra.mxu1 %v534_v30  ;;  %v549_v54 = vpack.c.bf16 %v220_v52, %v219_v51  ;;  %v552_v56 = vpack.c.bf16 %v222_v55, %v221_v53  ;;  %v223_v57 = vld [vmem:[%s890_s5 + $0x20] sm:$0xff]  ;;  %v224_v58 = vld [vmem:[%s890_s5 + $0x28] sm:$0xff]  ;;  %v225_v60 = vld [vmem:[%s890_s5 + $0x30] sm:$0xff] }
  0x13   :  { %536 = vmatprep.subr.bf16.mxu1 %v625_v3  ;;  %v555_v59 = vpack.c.bf16 %v224_v58, %v223_v57  ;;  %v226_v61 = vld [vmem:[%s890_s5 + $0x38] sm:$0xff]  ;;  %v227_v63 = vld [vmem:[%s890_s5 + $0x40] sm:$0xff]  ;;  %v228_v0 = vld [vmem:[%s890_s5 + $0x48] sm:$0xff] }
  0x14   :  { %514 = vmatpush3.bf16.msra.mxu0 %v513_v27  ;;  %v558_v62 = vpack.c.bf16 %v226_v61, %v225_v60  ;;  %v561_v1 = vpack.c.bf16 %v228_v0, %v227_v63  ;;  %v229_v2 = vld [vmem:[%s890_s5 + $0x50] sm:$0xff]  ;;  %v230_v4 = vld [vmem:[%s890_s5 + $0x58] sm:$0xff]  ;;  %v232_v7 = vld [vmem:[%s890_s5 + $0x68] sm:$0xff] }
  0x15   :  { %515 = vmatprep.subr.bf16.mxu0 %v625_v3  ;;  %v564_v5 = vpack.c.bf16 %v230_v4, %v229_v2  ;;  %v341_v9 = vld [vmem:[%s887_s2] ss:$0 sm:$0xff]  ;;  %v233_v14 = vld [vmem:[%s890_s5 + $0x70] sm:$0xff]  ;;  %v234_v15 = vld [vmem:[%s890_s5 + $0x78] sm:$0xff]  ;;  %s628_s2 = smov [#allocation2]  }
  0x16   :  { %538 = vmatpush3.bf16.msra.mxu1 %v537_v36  ;;  %v570_v16 = vpack.c.bf16 %v234_v15, %v233_v14  ;;  %s319_s13 = sshll.u32 %s628_s2, 4  ;;  %s320_s13 = int_to_ptr.vmem [resolvable:$true] %s319_s13 }
  0x17   :  { %539 = vmatprep.subr.bf16.mxu1 %v625_v3  ;;  %s577_s14 = scalar_lea.vmem %s320_s13, 32  ;;  %p582_p1 = scmp.lt.s32.totalorder %s320_s13, %s320_s13 }
  0x18   :  { %517 = vmatpush3.bf16.msra.mxu0 %v516_v33  ;;  %p578_p0 = scmp.ne.s32.totalorder %s320_s13, %s577_s14  ;;  %p583_p2 = scmp.lt.s32.totalorder %s577_s14, %s577_s14 }
  0x19   :  { %518 = vmatprep.subr.bf16.mxu0 %v625_v3 }
  0x1a   :  { %541 = vmatpush3.bf16.msra.mxu1 %v540_v42  ;;  %p584_p3 = por %p583_p2, %p582_p1 }
  0x1b   :  { %542 = vmatprep.subr.bf16.mxu1 %v625_v3 }
  0x1c   :  { %520 = vmatpush3.bf16.msra.mxu0 %v519_v39  ;;  %p585_p4 = pnand %p584_p3, %p578_p0 }
  0x1d   :  { %521 = vmatprep.subr.bf16.mxu0 %v625_v3 }
  0x1e   :  { %544 = vmatpush3.bf16.msra.mxu1 %v543_v46 }
  0x1f   :  { %545 = vmatprep.subr.bf16.mxu1 %v625_v3 }
  0x20   :  { %523 = vmatpush3.bf16.msra.mxu0 %v522_v45 }
  0x21   :  { %548 = vmatprep.subr.bf16.mxu0 %v625_v3 }
  0x22   :  { %547 = vmatpush3.bf16.msra.mxu1 %v546_v50 }
  0x23   :  { %428 = vmatmul.mubr.f32.vlgmr.msra.gmra.mrb[0].mxu0 %v30_v47 }
  0x24   :  { %497 = vmatprep.mubr.msk.f32.mxu0 %vm626_vm0, %v627_v6  ;;  %550 = vmatpush3.bf16.msra.mxu0 %v549_v54  ;;  %v231_v6 = vld [vmem:[%s890_s5 + $0x60] sm:$0xff] }
  0x25   :  { %551 = vmatprep.subr.bf16.mxu0 %v625_v3  ;;  %v567_v8 = vpack.c.bf16 %v232_v7, %v231_v6 }
  0x28   :  { %553 = vmatpush3.bf16.msra.mxu0 %v552_v56 }
  0x29   :  { %554 = vmatprep.subr.bf16.mxu0 %v625_v3 }
  0x2c   :  { %556 = vmatpush3.bf16.msra.mxu0 %v555_v59 }
  0x2d   :  { %557 = vmatprep.subr.bf16.mxu0 %v625_v3 }
  0x30   :  { %559 = vmatpush3.bf16.msra.mxu0 %v558_v62 }
  0x31   :  { %560 = vmatprep.subr.bf16.mxu0 %v625_v3 }
  0x34   :  { %562 = vmatpush3.bf16.msra.mxu0 %v561_v1 }
  0x35   :  { %563 = vmatprep.subr.bf16.mxu0 %v625_v3 }
  0x38   :  { %565 = vmatpush3.bf16.msra.mxu0 %v564_v5 }
  0x39   :  { %566 = vmatprep.subr.bf16.mxu0 %v625_v3 }
  0x3c   :  { %568 = vmatpush3.bf16.msra.mxu0 %v567_v8 }
  0x3d   :  { %569 = vmatprep.subr.bf16.mxu0 %v625_v3  ;;  %v342_v3 = vld [vmem:[%s889_s4] ss:$0 sm:$0xff] }
  0x40   :  { %571 = vmatpush3.bf16.msra.mxu0 %v570_v16 }
  0xf6   :  { %v120_v10 = vpop.f32.mrb[0].mxu0 }
  0xf7   :  { %v121_v11 = vadd.f32 %v341_v9, %v120_v10  ;;  %v429_v12 = vpop.f32.mrb[1].mxu0 }
  0xf9   :  { %v124_v13 = vmax.f32 %v121_v11, 0.0 }
  0xfb   :  { %463 = vmatmul.mubr.f32.vlgmr.msra.gmra.mrb[0].mxu1 %v124_v13 }
 0x1ce   :  { %v214_v17 = vpop.f32.mrb[0].mxu1 }
 0x1cf   :  { %v215_v18 = vadd.f32 %v342_v3, %v214_v17  ;;  %v464_v19 = vpop.f32.mrb[1].mxu1 }
 0x1d1   :  { %218 = vst [vmem:[#allocation2] sm:$0x3] %v215_v18  ;;  %498 = vmatmul.mubr.f32.vlgmr.msra.gmra.mrb[2].mxu0 %v215_v18 }
 0x1d2   :  { %588 = shalt.err (!%p585_p4)
}
 0x1d3   :  { %s589_s16 = scalar_lea.hbm %s892_s7, 32 }
 0x1d4   :  { %p590_p5 = scmp.ne.s32.totalorder %s892_s7, %s589_s16  ;;  %p593_p6 = scmp.lt.u32.totalorder %s589_s16, %s892_s7 }
 0x1d6   :  { %p595_p7 = pnand %p593_p6, %p590_p5 }
 0x1d8   :  { %598 = shalt.err (!%p595_p7)
}
 0x1d9   :  { %322 = dma.vmem_to_hbm [thread:$0]  %s320_s13, 32, %s892_s7, [#allocation3]   ;;  %v343_v20 = vld [vmem:[%s891_s6] ss:$0 sm:$0xff] }
 0x1da   :  { %s629_s23 = smov [#allocation4]  }
 0x1db   :  { %s329_s24 = sshll.u32 %s629_s23, 4  ;;  %s330_s24 = int_to_ptr.vmem [resolvable:$true] %s329_s24 }
 0x1dc   :  { %s599_s25 = scalar_lea.vmem %s330_s24, 32  ;;  %p604_p9 = scmp.lt.s32.totalorder %s330_s24, %s330_s24 }
 0x1dd   :  { %p600_p8 = scmp.ne.s32.totalorder %s330_s24, %s599_s25  ;;  %p605_p10 = scmp.lt.s32.totalorder %s599_s25, %s599_s25 }
 0x1df   :  { %p606_p11 = por %p605_p10, %p604_p9 }
 0x1e1   :  { %p607_p12 = pnand %p606_p11, %p600_p8 }
 0x2a4   :  { %v308_v21 = vpop.f32.mrb[2].mxu0 }
 0x2a5   :  { %v309_v22 = vadd.f32 %v343_v20, %v308_v21  ;;  %v499_v23 = vpop.f32.mrb[3].mxu0 }
 0x2a7   :  { %312 = vst [vmem:[#allocation4] sm:$0x3] %v309_v22 }
 0x2a8   :  { %610 = shalt.err (!%p607_p12)
}
 0x2a9   :  { %s611_s26 = scalar_lea.hbm %s893_s8, 32 }
 0x2aa   :  { %p612_p13 = scmp.ne.s32.totalorder %s893_s8, %s611_s26  ;;  %p615_p0 = scmp.lt.u32.totalorder %s611_s26, %s893_s8 }
 0x2ac   :  { %p617_p1 = pnand %p615_p0, %p612_p13 }
 0x2ae   :  { %620 = shalt.err (!%p617_p1)
}
 0x2af   :  { %332 = dma.vmem_to_hbm [thread:$0]  %s330_s24, 32, %s893_s8, [#allocation5]  }
 0x2b0   :  { %621 = dma.done.wait [#allocation3], 32  }
 0x2b1   :  { %622 = vsyncadd [#allocation3], 4294967264 }
 0x2b2   :  { %623 = dma.done.wait [#allocation5], 32  }
 0x2b3   :  { %624 = vsyncadd [#allocation5], 4294967264 }
 0x2b4   :  { %339 = vsyncpa [#allocation3], 1 }
 0x2b5   :  { %340 = vsyncpa [#allocation5], 1 }

// kernel: clsnet_forward.2
= control target key start
LH: loop header
LB: loop body
LE: loop exit
PB: predicated region body
PF: predicated region fallthrough
CT: control target
= control target key end

     0   :  { %s981_s15 = smov 0   ;;  %s1147_s0 = inlined_call_operand.vmem [shape: f32[2,256,36], index: 0, kind: input, shape index: {}]   ;;  %s1148_s1 = inlined_call_operand.vmem [shape: f32[36,128], index: 1, kind: input, shape index: {}]   ;;  %s1149_s2 = inlined_call_operand.vmem [shape: f32[1,128], index: 2, kind: input, shape index: {}]   ;;  %s1150_s3 = inlined_call_operand.vmem [shape: f32[1,256], index: 3, kind: input, shape index: {}]   ;;  %s1151_s4 = inlined_call_operand.vmem [shape: f32[2,1,128], index: 4, kind: output, shape index: {}]  }
   0x1 LB: > { %s726_s16 = sadd.s32 4294967295, %s954_s15   ;;  %p730_p0 = scmp.ge.s32.totalorder %s954_s15, 1  ;;  %s954_s15 = sphi %s981_s15, %s14_s15  }
   0x2   : > { %p162_p1 = scmp.lt.s32.totalorder %s954_s15, 3 }
   0x4   : > { %p163_p2 = pnand %p730_p0, %p162_p1 }
   0x5   : > { %v226_v0 = vld [vmem:[%s1148_s1] sm:$0xff] (!%p163_p2)  ;;  %v227_v1 = vld [vmem:[%s1148_s1 + $0x8] sm:$0xff] (!%p163_p2)  ;;  %v228_v2 = vld [vmem:[%s1148_s1 + $0x10] sm:$0xff] (!%p163_p2)  ;;  %p186_p3 = scmp.lt.s32.totalorder (!%p163_p2), %s726_s16, 1  ;;  %vm238_vm0 = vcmask (!%p163_p2), 293888   ;;  %vm335_vm1 = vcmask (!%p163_p2), 1043456   ;;  %v598_v39 = vlaneseq (!%p163_p2) }
   0x6   : > { %166 = sbr.rel (%p163_p2) target bundleno = 517 (0x205), region = 36  ;;  %v900_v3 = vpack.c.bf16 (!%p163_p2), %v227_v1, %v226_v0  ;;  %v229_v4 = vld [vmem:[%s1148_s1 + $0x18] sm:$0xff] (!%p163_p2)  ;;  %v230_v6 = vld [vmem:[%s1148_s1 + $0x20] sm:$0xf] (!%p163_p2) }
   0x7   : > { %v904_v5 = vpack.c.bf16 (!%p163_p2), %v229_v4, %v228_v2  ;;  %v599_v40 = vshrl.u32 (!%p163_p2), %v598_v39, 7  ;;  %v596_v42 = vld [vmem:[%s1150_s3] sm:$0x3] (!%p163_p2) }
   0x8   : > { %901 = vmatprep.subr.bf16.mxu0 (!%p163_p2), %v900_v3  ;;  %v1084_v46 = vld [vmem:[%s1149_s2] ss:$0 sm:$0xff] (!%p163_p2) }
   0x9   : > { %903 = vmatpush3.bf16.msra.mxu0 (!%p163_p2), %v900_v3  ;;  %v604_v41 = vsub.s32 (!%p163_p2), 1, %v599_v40  ;;  %v600_v43 = vsub.s32 (!%p163_p2), 0, %v599_v40 }
   0xa   : > { %905 = vmatprep.subr.bf16.mxu0 (!%p163_p2), %v904_v5 }
   0xb   : > { %v605_v44 = vrot.slane (!%p163_p2), %v596_v42, %v604_v41  ;;  %v1079_v45 = vrot.slane (!%p163_p2), %v596_v42, %v600_v43 }
   0xd   : > { %s1153_s16 = smov (!%p186_p3, %s726_s16), 1  ;;  %907 = vmatpush3.bf16.msra.mxu0 %v904_v5  ;;  %672 = vmatprep.mubr.f32.mxu1 %v605_v44 }
   0xe   : > { %s769_s25 = sshll.u32 %s1153_s16, 8  ;;  %850 = vmatprep.subr.msk.mxu0 %vm335_vm1, %v230_v6  ;;  %s193_s11 = scalar_lea.vmem %s1151_s4, %s1153_s16 }
   0xf   : > { %s1007_s28 = scalar_lea.vmem %s1147_s0, %s769_s25 }
  0x10   : > { %v194_v7 = vld [vmem:[%s1007_s28] sm:$0xff]  ;;  %v195_v8 = vld [vmem:[%s1007_s28 + $0x8] sm:$0xff]  ;;  %v196_v9 = vld [vmem:[%s1007_s28 + $0x10] sm:$0xff] }
  0x11   : > { %852 = vmatprep.mubr.msk.f32.mxu0 %vm238_vm0, %v194_v7  ;;  %851 = vmatpush3.msk.msra.mxu0 %vm335_vm1, %v230_v6  ;;  %v197_v10 = vld [vmem:[%s1007_s28 + $0x18] sm:$0xff]  ;;  %v198_v11 = vld [vmem:[%s1007_s28 + $0x20] sm:$0xff]  ;;  %v199_v12 = vld [vmem:[%s1007_s28 + $0x28] sm:$0xff] }
  0x12   : > { %853 = vmatmul.mubr.msk.f32.vlgmr.msra.gmra.mrb[0].mxu0 %vm238_vm0, %v195_v8  ;;  %v200_v13 = vld [vmem:[%s1007_s28 + $0x30] sm:$0xff]  ;;  %v201_v14 = vld [vmem:[%s1007_s28 + $0x38] sm:$0xff]  ;;  %v202_v15 = vld [vmem:[%s1007_s28 + $0x40] sm:$0xff] }
  0x13   : > { %855 = vmatprep.mubr.msk.f32.mxu0 %vm238_vm0, %v196_v9  ;;  %v203_v16 = vld [vmem:[%s1007_s28 + $0x48] sm:$0xff]  ;;  %v204_v17 = vld [vmem:[%s1007_s28 + $0x50] sm:$0xff]  ;;  %v205_v18 = vld [vmem:[%s1007_s28 + $0x58] sm:$0xff] }
  0x14   : > { %v206_v19 = vld [vmem:[%s1007_s28 + $0x60] sm:$0xff]  ;;  %v207_v20 = vld [vmem:[%s1007_s28 + $0x68] sm:$0xff]  ;;  %v208_v21 = vld [vmem:[%s1007_s28 + $0x70] sm:$0xff] }
  0x15   : > { %v209_v22 = vld [vmem:[%s1007_s28 + $0x78] sm:$0xff]  ;;  %v210_v23 = vld [vmem:[%s1007_s28 + $0x80] sm:$0xff]  ;;  %v211_v24 = vld [vmem:[%s1007_s28 + $0x88] sm:$0xff] }
  0x16   : > { %856 = vmatmul.mubr.msk.f32.gmra.mrb[2].mxu0 %vm238_vm0, %v197_v10  ;;  %v212_v25 = vld [vmem:[%s1007_s28 + $0x90] sm:$0xff]  ;;  %v213_v26 = vld [vmem:[%s1007_s28 + $0x98] sm:$0xff]  ;;  %v214_v27 = vld [vmem:[%s1007_s28 + $0xa0] sm:$0xff] }
  0x17   : > { %858 = vmatprep.mubr.msk.f32.mxu0 %vm238_vm0, %v198_v11  ;;  %v215_v28 = vld [vmem:[%s1007_s28 + $0xa8] sm:$0xff]  ;;  %v216_v29 = vld [vmem:[%s1007_s28 + $0xb0] sm:$0xff]  ;;  %v217_v30 = vld [vmem:[%s1007_s28 + $0xb8] sm:$0xff] }
  0x18   : > { %v218_v31 = vld [vmem:[%s1007_s28 + $0xc0] sm:$0xff]  ;;  %v219_v32 = vld [vmem:[%s1007_s28 + $0xc8] sm:$0xff]  ;;  %v220_v33 = vld [vmem:[%s1007_s28 + $0xd0] sm:$0xff] }
  0x19   : > { %v221_v34 = vld [vmem:[%s1007_s28 + $0xd8] sm:$0xff]  ;;  %v222_v35 = vld [vmem:[%s1007_s28 + $0xe0] sm:$0xff]  ;;  %v223_v36 = vld [vmem:[%s1007_s28 + $0xe8] sm:$0xff] }
  0x1a   : > { %859 = vmatmul.mubr.msk.f32.gmra.mrb[4].mxu0 %vm238_vm0, %v199_v12  ;;  %v224_v37 = vld [vmem:[%s1007_s28 + $0xf0] sm:$0xff]  ;;  %v225_v38 = vld [vmem:[%s1007_s28 + $0xf8] sm:$0xff] }
  0x1b   : > { %861 = vmatprep.mubr.msk.f32.mxu0 %vm238_vm0, %v200_v13 }
  0x1e   : > { %862 = vmatmul.mubr.msk.f32.gmra.mrb[6].mxu0 %vm238_vm0, %v201_v14 }
  0x1f   : > { %864 = vmatprep.mubr.msk.f32.mxu0 %vm238_vm0, %v202_v15 }
  0x22   : > { %865 = vmatmul.mubr.msk.f32.gmra.mrb[8].mxu0 %vm238_vm0, %v203_v16 }
  0x23   : > { %867 = vmatprep.mubr.msk.f32.mxu0 %vm238_vm0, %v204_v17 }
  0x26   : > { %868 = vmatmul.mubr.msk.f32.gmra.mrb[10].mxu0 %vm238_vm0, %v205_v18 }
  0x27   : > { %870 = vmatprep.mubr.msk.f32.mxu0 %vm238_vm0, %v206_v19 }
  0x2a   : > { %871 = vmatmul.mubr.msk.f32.gmra.mrb[12].mxu0 %vm238_vm0, %v207_v20 }
  0x2b   : > { %873 = vmatprep.mubr.msk.f32.mxu0 %vm238_vm0, %v208_v21 }
  0x2e   : > { %874 = vmatmul.mubr.msk.f32.gmra.mrb[14].mxu0 %vm238_vm0, %v209_v22 }
  0x2f   : > { %876 = vmatprep.mubr.msk.f32.mxu0 %vm238_vm0, %v210_v23 }
  0x32   : > { %877 = vmatmul.mubr.msk.f32.gmra.mrb[16].mxu0 %vm238_vm0, %v211_v24 }
  0x33   : > { %879 = vmatprep.mubr.msk.f32.mxu0 %vm238_vm0, %v212_v25 }
  0x36   : > { %880 = vmatmul.mubr.msk.f32.gmra.mrb[18].mxu0 %vm238_vm0, %v213_v26 }
  0x37   : > { %882 = vmatprep.mubr.msk.f32.mxu0 %vm238_vm0, %v214_v27 }
  0x3a   : > { %883 = vmatmul.mubr.msk.f32.gmra.mrb[20].mxu0 %vm238_vm0, %v215_v28 }
  0x3b   : > { %885 = vmatprep.mubr.msk.f32.mxu0 %vm238_vm0, %v216_v29 }
  0x3e   : > { %886 = vmatmul.mubr.msk.f32.gmra.mrb[22].mxu0 %vm238_vm0, %v217_v30 }
  0x3f   : > { %888 = vmatprep.mubr.msk.f32.mxu0 %vm238_vm0, %v218_v31 }
  0x42   : > { %889 = vmatmul.mubr.msk.f32.gmra.mrb[24].mxu0 %vm238_vm0, %v219_v32 }
  0x43   : > { %891 = vmatprep.mubr.msk.f32.mxu0 %vm238_vm0, %v220_v33 }
  0x46   : > { %892 = vmatmul.mubr.msk.f32.gmra.mrb[26].mxu0 %vm238_vm0, %v221_v34 }
  0x47   : > { %894 = vmatprep.mubr.msk.f32.mxu0 %vm238_vm0, %v222_v35 }
  0x4a   : > { %895 = vmatmul.mubr.msk.f32.gmra.mrb[28].mxu0 %vm238_vm0, %v223_v36 }
  0x4b   : > { %897 = vmatprep.mubr.msk.f32.mxu0 %vm238_vm0, %v224_v37 }
  0x4e   : > { %898 = vmatmul.mubr.msk.f32.gmra.mrb[30].mxu0 %vm238_vm0, %v225_v38 }
  0xe5   : > { %v854_v47 = vpop.f32.mrb[0].mxu0 }
  0xe6   : > { %v411_v48 = vadd.f32 %v854_v47, %v1084_v46  ;;  %v405_v49 = vpop.f32.mrb[1].mxu0 }
  0xe7   : > { %v406_v50 = vadd.f32 %v1084_v46, %v405_v49 }
  0xe8   : > { %v565_v51 = vmax.f32 %v411_v48, 0.0 }
  0xe9   : > { %v564_v52 = vmax.f32 %v406_v50, 0.0  ;;  %v857_v53 = vpop.f32.mrb[2].mxu0 }
  0xea   : > { %v421_v54 = vadd.f32 %v857_v53, %v1084_v46  ;;  %v415_v55 = vpop.f32.mrb[3].mxu0 }
  0xeb   : > { %v416_v56 = vadd.f32 %v1084_v46, %v415_v55  ;;  %v910_v57 = vpack.c.bf16 %v565_v51, %v564_v52 }
  0xec   : > { %v567_v58 = vmax.f32 %v421_v54, 0.0 }
  0xed   : > { %v566_v59 = vmax.f32 %v416_v56, 0.0  ;;  %v860_v60 = vpop.f32.mrb[4].mxu0 }
  0xee   : > { %v431_v61 = vadd.f32 %v860_v60, %v1084_v46  ;;  %v425_v62 = vpop.f32.mrb[5].mxu0 }
  0xef   : > { %v1091_v63 = vpack.c.bf16 %v567_v58, %v566_v59  ;;  %v426_v0 = vadd.f32 %v1084_v46, %v425_v62 }
  0xf0   : > { %v569_v1 = vmax.f32 %v431_v61, 0.0 }
  0xf1   : > { %v568_v2 = vmax.f32 %v426_v0, 0.0  ;;  %v863_v3 = vpop.f32.mrb[6].mxu0 }
  0xf2   : > { %v441_v4 = vadd.f32 %v863_v3, %v1084_v46  ;;  %v435_v5 = vpop.f32.mrb[7].mxu0 }
  0xf3   : > { %v1095_v6 = vpack.c.bf16 %v569_v1, %v568_v2  ;;  %v436_v7 = vadd.f32 %v1084_v46, %v435_v5 }
  0xf4   : > { %v571_v8 = vmax.f32 %v441_v4, 0.0 }
  0xf5   : > { %v570_v9 = vmax.f32 %v436_v7, 0.0  ;;  %v866_v10 = vpop.f32.mrb[8].mxu0 }
  0xf6   : > { %v451_v11 = vadd.f32 %v866_v10, %v1084_v46  ;;  %v445_v12 = vpop.f32.mrb[9].mxu0 }
  0xf7   : > { %v1099_v13 = vpack.c.bf16 %v571_v8, %v570_v9  ;;  %v446_v14 = vadd.f32 %v1084_v46, %v445_v12 }
  0xf8   : > { %v573_v15 = vmax.f32 %v451_v11, 0.0 }
  0xf9   : > { %v572_v16 = vmax.f32 %v446_v14, 0.0  ;;  %v869_v17 = vpop.f32.mrb[10].mxu0 }
  0xfa   : > { %v461_v18 = vadd.f32 %v869_v17, %v1084_v46  ;;  %v455_v19 = vpop.f32.mrb[11].mxu0 }
  0xfb   : > { %v1103_v20 = vpack.c.bf16 %v573_v15, %v572_v16  ;;  %v456_v21 = vadd.f32 %v1084_v46, %v455_v19 }
  0xfc   : > { %v575_v22 = vmax.f32 %v461_v18, 0.0 }
  0xfd   : > { %v574_v23 = vmax.f32 %v456_v21, 0.0  ;;  %v872_v24 = vpop.f32.mrb[12].mxu0 }
  0xfe   : > { %v471_v25 = vadd.f32 %v872_v24, %v1084_v46  ;;  %v465_v26 = vpop.f32.mrb[13].mxu0 }
  0xff   : > { %v1107_v27 = vpack.c.bf16 %v575_v22, %v574_v23  ;;  %v466_v28 = vadd.f32 %v1084_v46, %v465_v26 }
 0x100   : > { %v577_v29 = vmax.f32 %v471_v25, 0.0 }
 0x101   : > { %v576_v30 = vmax.f32 %v466_v28, 0.0  ;;  %v875_v31 = vpop.f32.mrb[14].mxu0 }
 0x102   : > { %v481_v32 = vadd.f32 %v875_v31, %v1084_v46  ;;  %v475_v33 = vpop.f32.mrb[15].mxu0 }
 0x103   : > { %v1111_v34 = vpack.c.bf16 %v577_v29, %v576_v30  ;;  %v476_v35 = vadd.f32 %v1084_v46, %v475_v33 }
 0x104   : > { %v579_v36 = vmax.f32 %v481_v32, 0.0 }
 0x105   : > { %v578_v37 = vmax.f32 %v476_v35, 0.0  ;;  %v878_v38 = vpop.f32.mrb[16].mxu0 }
 0x106   : > { %v491_v39 = vadd.f32 %v878_v38, %v1084_v46  ;;  %v485_v40 = vpop.f32.mrb[17].mxu0 }
 0x107   : > { %v1115_v41 = vpack.c.bf16 %v579_v36, %v578_v37  ;;  %v486_v42 = vadd.f32 %v1084_v46, %v485_v40 }
 0x108   : > { %v581_v43 = vmax.f32 %v491_v39, 0.0 }
 0x109   : > { %v580_v44 = vmax.f32 %v486_v42, 0.0  ;;  %v881_v47 = vpop.f32.mrb[18].mxu0 }
 0x10a   : > { %v501_v48 = vadd.f32 %v881_v47, %v1084_v46  ;;  %v495_v49 = vpop.f32.mrb[19].mxu0 }
 0x10b   : > { %v496_v50 = vadd.f32 %v1084_v46, %v495_v49  ;;  %v908_v51 = vpack.c.bf16 %v581_v43, %v580_v44 }
 0x10c   : > { %v583_v52 = vmax.f32 %v501_v48, 0.0 }
 0x10d   : > { %v582_v53 = vmax.f32 %v496_v50, 0.0  ;;  %v884_v54 = vpop.f32.mrb[20].mxu0  ;;  %909 = vmatprep.subr.bf16.mxu1 %v908_v51 }
 0x10e   : > { %v511_v55 = vadd.f32 %v884_v54, %v1084_v46  ;;  %v505_v56 = vpop.f32.mrb[21].mxu0  ;;  %911 = vmatpush3.bf16.msra.mxu1 %v910_v57 }
 0x10f   : > { %v912_v58 = vpack.c.bf16 %v583_v52, %v582_v53  ;;  %v506_v59 = vadd.f32 %v1084_v46, %v505_v56 }
 0x110   : > { %v585_v60 = vmax.f32 %v511_v55, 0.0 }
 0x111   : > { %v584_v61 = vmax.f32 %v506_v59, 0.0  ;;  %v887_v62 = vpop.f32.mrb[22].mxu0  ;;  %913 = vmatprep.subr.bf16.mxu1 %v912_v58 }
 0x112   : > { %v521_v0 = vadd.f32 %v887_v62, %v1084_v46  ;;  %v515_v1 = vpop.f32.mrb[23].mxu0  ;;  %915 = vmatpush3.bf16.msra.mxu1 %v1091_v63 }
 0x113   : > { %v916_v2 = vpack.c.bf16 %v585_v60, %v584_v61  ;;  %v516_v3 = vadd.f32 %v1084_v46, %v515_v1 }
 0x114   : > { %v587_v4 = vmax.f32 %v521_v0, 0.0 }
 0x115   : > { %v586_v5 = vmax.f32 %v516_v3, 0.0  ;;  %v890_v7 = vpop.f32.mrb[24].mxu0  ;;  %917 = vmatprep.subr.bf16.mxu1 %v916_v2 }
 0x116   : > { %v531_v57 = vadd.f32 %v890_v7, %v1084_v46  ;;  %v525_v8 = vpop.f32.mrb[25].mxu0  ;;  %919 = vmatpush3.bf16.msra.mxu1 %v1095_v6 }
 0x117   : > { %v920_v9 = vpack.c.bf16 %v587_v4, %v586_v5  ;;  %v526_v10 = vadd.f32 %v1084_v46, %v525_v8 }
 0x118   : > { %v589_v11 = vmax.f32 %v531_v57, 0.0 }
 0x119   : > { %v588_v12 = vmax.f32 %v526_v10, 0.0  ;;  %v893_v14 = vpop.f32.mrb[26].mxu0  ;;  %921 = vmatprep.subr.bf16.mxu1 %v920_v9 }
 0x11a   : > { %v541_v63 = vadd.f32 %v893_v14, %v1084_v46  ;;  %v535_v15 = vpop.f32.mrb[27].mxu0  ;;  %923 = vmatpush3.bf16.msra.mxu1 %v1099_v13 }
 0x11b   : > { %v924_v16 = vpack.c.bf16 %v589_v11, %v588_v12  ;;  %v536_v17 = vadd.f32 %v1084_v46, %v535_v15 }
 0x11c   : > { %v591_v18 = vmax.f32 %v541_v63, 0.0 }
 0x11d   : > { %v590_v19 = vmax.f32 %v536_v17, 0.0  ;;  %v896_v21 = vpop.f32.mrb[28].mxu0  ;;  %925 = vmatprep.subr.bf16.mxu1 %v924_v16 }
 0x11e   : > { %v551_v6 = vadd.f32 %v896_v21, %v1084_v46  ;;  %v545_v22 = vpop.f32.mrb[29].mxu0  ;;  %927 = vmatpush3.bf16.msra.mxu1 %v1103_v20 }
 0x11f   : > { %v928_v23 = vpack.c.bf16 %v591_v18, %v590_v19  ;;  %v546_v24 = vadd.f32 %v1084_v46, %v545_v22 }
 0x120   : > { %v593_v25 = vmax.f32 %v551_v6, 0.0 }
 0x121   : > { %v592_v26 = vmax.f32 %v546_v24, 0.0  ;;  %v899_v28 = vpop.f32.mrb[30].mxu0  ;;  %929 = vmatprep.subr.bf16.mxu1 %v928_v23 }
 0x122   : > { %v561_v13 = vadd.f32 %v899_v28, %v1084_v46  ;;  %v555_v29 = vpop.f32.mrb[31].mxu0  ;;  %931 = vmatpush3.bf16.msra.mxu1 %v1107_v27 }
 0x123   : > { %v932_v30 = vpack.c.bf16 %v593_v25, %v592_v26  ;;  %v556_v31 = vadd.f32 %v1084_v46, %v555_v29 }
 0x124   : > { %v595_v32 = vmax.f32 %v561_v13, 0.0 }
 0x125   : > { %v594_v33 = vmax.f32 %v556_v31, 0.0  ;;  %933 = vmatprep.subr.bf16.mxu1 %v932_v30 }
 0x126   : > { %935 = vmatpush3.bf16.msra.mxu1 %v1111_v34 }
 0x127   : > { %v936_v20 = vpack.c.bf16 %v595_v32, %v594_v33 }
 0x129   : > { %937 = vmatprep.subr.bf16.mxu1 %v936_v20 }
 0x12a   : > { %939 = vmatpush3.bf16.msra.mxu1 %v1115_v41 }
 0x12d   : > { %673 = vmatmul.mubr.f32.vlgmr.msra.gmra.mrb[0].mxu1 %v1079_v45 }
 0x200   : > { %v839_v35 = vpop.f32.mrb[0].mxu1 }
 0x201   : > { %v840_v27 = vpop.f32.mrb[1].mxu1 }
 0x202   : > { %v841_v36 = vadd.f32 %v840_v27, %v839_v35 }
 0x204   : > { %678 = vst [vmem:[%s193_s11] sm:$0x1] %v841_v36 }
 0x205 PF: > { %s14_s15 = sadd.s32 1, %s954_s15  }
 0x206   : > { %p11_p4 = scmp.ge.s32.totalorder %s14_s15, 4  }
 0x208   :  { %13 = sbr.rel (!%p11_p4) target bundleno = 1 (0x1), region = 66 }

</bundles_post_ra>
